<compile_context>
chip_gen: v7x
topology: tpu7x:2x2x1
jax: 0.10.0
libtpu: 0.0.40
codegen_flags: <defaults>
</compile_context>

<pallas_src>
import functools

import jax
import jax.numpy as jnp
import numpy as np
from jax import lax
from jax.experimental import pallas as pl
from jax.experimental.pallas import tpu as pltpu


def _proxyanchor_kernel(labels_ref, batch_ref, proxies_ref, out_ref, *,
                        num_classes, tile_c, tiles_per_core, batch_size,
                        sphereradius, alpha, delta, compute_dtype):
    core = pl.program_id(0)
    t = pl.program_id(1)
    neg_inf = jnp.float32(-jnp.inf)

    @pl.when(t == 0)
    def _init():
        # Fresh lane-wise accumulator for this core's class-tile slice.
        out_ref[...] = jnp.zeros_like(out_ref)

    # ---- normalize the streamed (D, TILE_C) proxy tile column-wise (f32) ----
    p = proxies_ref[...].astype(jnp.float32)                        # (D, TILE_C)
    pinv = lax.rsqrt(jnp.maximum(jnp.sum(p * p, axis=0, keepdims=True), 1e-24))
    pn = (p * pinv).astype(compute_dtype)                           # (D, TILE_C)

    # Unit-vector similarity on the MXU; sphereradius^2 folded into the affine
    # constants below. Canonical (M,K)x(K,N) contraction, no transpose.
    sim = lax.dot_general(batch_ref[...], pn, (((1,), (0,)), ((), ())),
                          preferred_element_type=jnp.float32)       # (BS, TILE_C)

    r2 = sphereradius * sphereradius
    neg_arg = (alpha * r2) * sim + (alpha * delta)    # ==  alpha * (r2*sim + delta)
    pos_arg = (2.0 * alpha * delta) - neg_arg         # == -alpha * (r2*sim - delta)

    labels = labels_ref[...]                                        # (BS, 1) int32
    tile_idx = core * tiles_per_core + t
    class_base = tile_idx * tile_c
    class_ids = class_base + lax.broadcasted_iota(
        jnp.int32, (batch_size, tile_c), 1)
    onehot = labels == class_ids                                    # (BS, TILE_C)

    # ---- positive term: per-class masked LSE over same-class samples --------
    pos_m = jnp.where(onehot, pos_arg, neg_inf)
    m_pos = jnp.max(pos_m, axis=0, keepdims=True)                   # (1, TILE_C)
    m_pos_safe = jnp.where(m_pos > neg_inf, m_pos, 0.0)
    s_pos = jnp.sum(jnp.exp(pos_m - m_pos_safe), axis=0, keepdims=True)
    lse_pos = jnp.log(s_pos) + m_pos_safe                           # -inf if absent
    count = jnp.sum(onehot.astype(jnp.float32), axis=0, keepdims=True)
    pos_w = count * jnp.float32(1.0 / batch_size)

    # ---- negative term: per-class masked LSE over other-class samples -------
    neg_m = jnp.where(onehot, neg_inf, neg_arg)
    m_neg = jnp.max(neg_m, axis=0, keepdims=True)
    m_neg_safe = jnp.where(m_neg > neg_inf, m_neg, 0.0)
    s_neg = jnp.sum(jnp.exp(neg_m - m_neg_safe), axis=0, keepdims=True)
    lse_neg = jnp.log(s_neg) + m_neg_safe
    valid = (class_base + lax.broadcasted_iota(jnp.int32, (1, tile_c), 1)
             < num_classes).astype(jnp.float32)                     # class padding
    neg_w = valid * jnp.float32(1.0 / num_classes)

    # softplus via logaddexp; lane-wise accumulate (no per-step cross-lane sum)
    contrib = (pos_w * jnp.logaddexp(lse_pos, 0.0)
               + neg_w * jnp.logaddexp(lse_neg, 0.0))               # (1, TILE_C)
    out_ref[...] += contrib[None]                                   # (1, 1, TILE_C)


def _round_up(x, m):
    return (x + m - 1) // m * m


def _cdiv(a, b):
    return -(-a // b)


def proxyanchor_loss(batch, proxies, labels, *,
                     sphereradius=1.0, alpha=32.0, delta=0.1,
                     use_bf16_matmul=False, tile_c=None):
    """Forward pass of the ProxyAnchor criterion (pos + neg loss scalar)."""
    batch = jnp.asarray(batch, jnp.float32)
    proxies = jnp.asarray(proxies, jnp.float32)
    bs, d = batch.shape
    c = proxies.shape[0]
    labels2d = jnp.asarray(labels, jnp.int32).reshape(bs, 1)

    compute_dtype = jnp.bfloat16 if use_bf16_matmul else jnp.float32
    itemsize = jnp.dtype(compute_dtype).itemsize

    # ---- batch L2 normalization in the wrapper (single BS x D pass) ---------
    norm = jnp.sqrt(jnp.sum(batch * batch, axis=1, keepdims=True))
    batch_n = (batch / jnp.maximum(norm, 1e-12)).astype(compute_dtype)

    # ---- per-generation VMEM budget -> lane-aligned tile_c -------------------
    try:
        vmem_cap = int(pltpu.get_tpu_info().vmem_capacity_bytes)
    except Exception:
        vmem_cap = 64 << 20                       # conservative fallback
    if vmem_cap <= (64 << 20):                    # v7x-class (64 MiB physical)
        vmem_budget = 48 << 20
    else:                                         # v5e / v6e (128 MiB physical)
        vmem_budget = 100 << 20

    # Fixed VMEM: resident (normalized) batch + labels (worst-case x2) + slack.
    fixed = 2 * (bs * d * itemsize + bs * 128 * 4) + (4 << 20)
    # Per class column: double-buffered (D, tile_c) proxy stream plus ~10 f32
    # (BS, tile_c) intermediates (sim / args / masks / exps).
    per_col = 2 * d * itemsize + 10 * bs * 4

    if tile_c is None:
        budget_cols = max((vmem_budget - fixed) // per_col, 128)
        tile_c = max(128, (budget_cols // 128) * 128)
    else:
        tile_c = max(128, _round_up(int(tile_c), 128))
    tile_c = int(min(tile_c, 2048, _round_up(c, 128)))

    n_tiles = _cdiv(c, tile_c)
    n_split = 2 if n_tiles >= 2 else 1            # 2 TCs on v7x; serial elsewhere
    tiles_per_core = _cdiv(n_tiles, n_split)
    c_pad = n_split * tiles_per_core * tile_c

    proxies_p = proxies
    if c_pad != c:
        proxies_p = jnp.pad(proxies, ((0, c_pad - c), (0, 0)))
    proxies_t = proxies_p.astype(compute_dtype).T  # (D, C_pad), MXU-native (K, N)

    kernel = functools.partial(
        _proxyanchor_kernel,
        num_classes=c, tile_c=tile_c, tiles_per_core=tiles_per_core,
        batch_size=bs, sphereradius=float(sphereradius), alpha=float(alpha),
        delta=float(delta), compute_dtype=compute_dtype)

    vmem_est = (fixed
                + 2 * d * tile_c * itemsize       # double-buffered proxy tiles
                + 10 * bs * tile_c * 4            # (BS, tile_c) intermediates
                + 2 * tile_c * 4                  # accumulator block
                + (4 << 20))                      # Mosaic internal headroom
    vmem_limit = int(min(vmem_budget, max(vmem_est, 16 << 20)))

    out = pl.pallas_call(
        kernel,
        out_shape=jax.ShapeDtypeStruct((n_split, 1, tile_c), jnp.float32),
        grid_spec=pltpu.PrefetchScalarGridSpec(
            num_scalar_prefetch=0,
            grid=(n_split, tiles_per_core),
            in_specs=[
                pl.BlockSpec((bs, 1), lambda s, t: (0, 0)),         # labels (resident)
                pl.BlockSpec((bs, d), lambda s, t: (0, 0)),         # batch  (resident)
                pl.BlockSpec((d, tile_c),                           # proxy tile (streamed)
                             lambda s, t, tpc=tiles_per_core: (0, s * tpc + t)),
            ],
            out_specs=pl.BlockSpec((1, 1, tile_c), lambda s, t: (s, 0, 0)),
        ),
        compiler_params=pltpu.CompilerParams(
            dimension_semantics=("parallel", "arbitrary"),
            vmem_limit_bytes=vmem_limit),
    )(labels2d, batch_n, proxies_t)

    # Padded classes contribute exactly zero (count==0 / `valid` mask).
    return jnp.sum(out)


def _reference_loss(batch, proxies, labels, sphereradius, alpha, delta):
    """Pure-JAX transcription of the PyTorch forward (for validation)."""
    def prep(x):
        n = jnp.linalg.norm(x, axis=1, keepdims=True)
        return sphereradius * x / jnp.maximum(n, 1e-12)

    labels = labels.astype(jnp.int32)
    b = prep(batch)
    p = prep(proxies)

    pos_proxies = p[labels]
    pos_s = b @ pos_proxies.T
    pos_s = -alpha * (pos_s - delta)
    max_v = pos_s.max(axis=0, keepdims=True)
    bsame = (labels[:, None] == labels[None, :]).astype(jnp.float32)
    pos = jax.nn.softplus(
        jnp.log(jnp.sum(jnp.exp(pos_s - max_v) * bsame.T, axis=0)) + max_v.reshape(-1)
    ).mean()

    neg_s = b @ p.T
    neg_s = alpha * (neg_s + delta)
    max_v = neg_s.max(axis=0, keepdims=True)
    diff = (jnp.arange(p.shape[0])[:, None] != labels[None, :]).astype(jnp.float32)
    neg = jax.nn.softplus(
        jnp.log(jnp.sum(jnp.exp(neg_s - max_v) * diff.T, axis=0)) + max_v.reshape(-1)
    ).mean()
    return pos + neg


if __name__ == "__main__":
    sphereradius = 1.0           # opt.loss_proxyanchor_sphereradius
    alpha = 32.0                 # opt.loss_proxyanchor_alpha
    delta = 0.1                  # opt.loss_proxyanchor_delta
    embed_div = 8.0              # opt.loss_proxyanchor_div

    key = jax.random.PRNGKey(0)
    k_batch, k_prox, k_b2, k_p2, k_l2 = jax.random.split(key, 5)

    # --- test 1: small shapes, f32 MXU path (exact semantics) ----------------
    BS, D, C = 8, 32, 4
    batch = jax.random.normal(k_batch, (BS, D), jnp.float32)
    proxies = jax.random.normal(k_prox, (C, D), jnp.float32) / embed_div
    labels = jnp.array([0, 1, 2, 3, 0, 1, 2, 3], dtype=jnp.int32)

    ref = _reference_loss(batch, proxies, labels, sphereradius, alpha, delta)
    loss = jax.block_until_ready(
        proxyanchor_loss(batch, proxies, labels,
                         sphereradius=sphereradius, alpha=alpha, delta=delta))
    assert np.allclose(np.asarray(loss), np.asarray(ref), rtol=1e-2, atol=5e-2), (loss, ref)

    # --- test 2: bf16-streamed path (HBM-halving fast path, loose tolerance) --
    loss_bf16 = jax.block_until_ready(
        proxyanchor_loss(batch, proxies, labels, sphereradius=sphereradius,
                         alpha=alpha, delta=delta, use_bf16_matmul=True))
    assert np.allclose(np.asarray(loss_bf16), np.asarray(ref), rtol=5e-2, atol=0.3), (loss_bf16, ref)

    # --- test 3: multi-tile + 2-way core-split path (forced tile_c=128) -------
    BS2, D2, C2 = 16, 32, 320
    batch2 = jax.random.normal(k_b2, (BS2, D2), jnp.float32)
    proxies2 = jax.random.normal(k_p2, (C2, D2), jnp.float32) / embed_div
    labels2 = jax.random.randint(k_l2, (BS2,), 0, C2, dtype=jnp.int32)
    ref2 = _reference_loss(batch2, proxies2, labels2, sphereradius, alpha, delta)
    loss2 = jax.block_until_ready(
        proxyanchor_loss(batch2, proxies2, labels2, sphereradius=sphereradius,
                         alpha=alpha, delta=delta, tile_c=128))
    assert np.allclose(np.asarray(loss2), np.asarray(ref2), rtol=1e-2, atol=5e-2), (loss2, ref2)

    print("KERNEL_OK")
</pallas_src>

<mosaic_0001>
module attributes {stable_mosaic.version = 11 : i64} {
  func.func @_proxyanchor_kernel(%arg0: i32, %arg1: i32, %arg2: memref<8x1xi32, #tpu.memory_space<vmem>>, %arg3: memref<8x32xf32, #tpu.memory_space<vmem>>, %arg4: memref<32x128xf32, #tpu.memory_space<vmem>>, %arg5: memref<1x1x128xf32, #tpu.memory_space<vmem>>) attributes {dimension_semantics = [#tpu.dimension_semantics<parallel>, #tpu.dimension_semantics<arbitrary>], iteration_bounds = array<i64: 1, 1>, scalar_prefetch = 0 : i64, scratch_operands = 0 : i64, tpu.core_type = #tpu.core_type<tc>, window_params = [{pipeline_mode = #tpu.pipeline_mode<synchronous>, transform_indices = @transform_0, window_bounds = array<i64: 8, 1>}, {pipeline_mode = #tpu.pipeline_mode<synchronous>, transform_indices = @transform_1, window_bounds = array<i64: 8, 32>}, {transform_indices = @transform_2, window_bounds = array<i64: 32, 128>}, {transform_indices = @transform_3, window_bounds = array<i64: 1, 1, 128>}]} {
    %c0_i32 = arith.constant 0 : i32
    %0 = arith.cmpi eq, %arg1, %c0_i32 : i32
    %1 = arith.extui %0 : i1 to i32
    %c0_i32_0 = arith.constant 0 : i32
    %2 = arith.cmpi ne, %1, %c0_i32_0 : i32
    scf.if %2 {
      %cst_34 = arith.constant 0.000000e+00 : f32
      %109 = vector.broadcast %cst_34 : f32 to vector<1x1x128xf32>
      %c0_35 = arith.constant 0 : index
      %c0_36 = arith.constant 0 : index
      %c0_37 = arith.constant 0 : index
      %110 = vector.load %arg5[%c0_35, %c0_36, %c0_37] : memref<1x1x128xf32, #tpu.memory_space<vmem>>, vector<1x1x128xf32>
      tpu.vector_store %arg5[%c0_35, %c0_36, %c0_37], %109 {strides = array<i32>} : memref<1x1x128xf32, #tpu.memory_space<vmem>>, vector<1x1x128xf32>,
    } else {
    }
    %c0 = arith.constant 0 : index
    %c0_1 = arith.constant 0 : index
    %3 = vector.load %arg4[%c0, %c0_1] : memref<32x128xf32, #tpu.memory_space<vmem>>, vector<32x128xf32>
    %4 = arith.mulf %3, %3 : vector<32x128xf32>
    %cst = arith.constant dense<0.000000e+00> : vector<128xf32>
    %5 = vector.multi_reduction <add>, %4, %cst [0] : vector<32x128xf32> to vector<128xf32>
    %6 = vector.shape_cast %5 : vector<128xf32> to vector<1x128xf32>
    %cst_2 = arith.constant 1.000000e-24 : f32
    %7 = vector.broadcast %cst_2 : f32 to vector<1x128xf32>
    %8 = arith.maximumf %6, %7 : vector<1x128xf32>
    %9 = math.rsqrt %8 : vector<1x128xf32>
    %10 = vector.broadcast %9 : vector<1x128xf32> to vector<32x128xf32>
    %11 = arith.mulf %3, %10 : vector<32x128xf32>
    %c0_3 = arith.constant 0 : index
    %c0_4 = arith.constant 0 : index
    %12 = vector.load %arg3[%c0_3, %c0_4] : memref<8x32xf32, #tpu.memory_space<vmem>>, vector<8x32xf32>
    %cst_5 = arith.constant dense<0.000000e+00> : vector<8x128xf32>
    %13 = tpu.matmul %12, %11, %cst_5 {dimension_numbers = #tpu.dot_dimension_numbers<[1], [0], [0], [1], [0, 0, 1, 1], [], []>} : vector<8x32xf32>, vector<32x128xf32>, vector<8x128xf32> -> vector<8x128xf32>
    %cst_6 = arith.constant 3.200000e+01 : f32
    %14 = vector.broadcast %cst_6 : f32 to vector<8x128xf32>
    %15 = arith.mulf %14, %13 : vector<8x128xf32>
    %cst_7 = arith.constant 3.200000e+00 : f32
    %16 = vector.broadcast %cst_7 : f32 to vector<8x128xf32>
    %17 = arith.addf %15, %16 : vector<8x128xf32>
    %cst_8 = arith.constant 6.400000e+00 : f32
    %18 = vector.broadcast %cst_8 : f32 to vector<8x128xf32>
    %19 = arith.subf %18, %17 : vector<8x128xf32>
    %c0_9 = arith.constant 0 : index
    %c0_10 = arith.constant 0 : index
    %20 = vector.load %arg2[%c0_9, %c0_10] : memref<8x1xi32, #tpu.memory_space<vmem>>, vector<8x1xi32>
    %c1_i32 = arith.constant 1 : i32
    %21 = arith.muli %arg0, %c1_i32 : i32
    %22 = arith.addi %21, %arg1 : i32
    %c128_i32 = arith.constant 128 : i32
    %23 = arith.muli %22, %c128_i32 : i32
    %24 = tpu.iota {dimensions = array<i32: 1>} : vector<8x128xi32>
    %25 = vector.broadcast %23 : i32 to vector<8x128xi32>
    %26 = arith.addi %25, %24 : vector<8x128xi32>
    %27 = vector.broadcast %20 : vector<8x1xi32> to vector<8x128xi32>
    %28 = arith.cmpi eq, %27, %26 : vector<8x128xi32>
    %cst_11 = arith.constant 0xFF800000 : f32
    %29 = vector.broadcast %cst_11 : f32 to vector<8x128xf32>
    %30 = arith.select %28, %19, %29 : vector<8x128xi1>, vector<8x128xf32>
    %cst_12 = arith.constant dense<0xFF800000> : vector<128xf32>
    %31 = vector.multi_reduction <maximumf>, %30, %cst_12 [0] : vector<8x128xf32> to vector<128xf32>
    %32 = vector.shape_cast %31 : vector<128xf32> to vector<1x128xf32>
    %cst_13 = arith.constant 0xFF800000 : f32
    %33 = vector.broadcast %cst_13 : f32 to vector<1x128xf32>
    %34 = arith.cmpf ogt, %32, %33 : vector<1x128xf32>
    %cst_14 = arith.constant 0.000000e+00 : f32
    %35 = vector.broadcast %cst_14 : f32 to vector<1x128xf32>
    %36 = arith.select %34, %32, %35 : vector<1x128xi1>, vector<1x128xf32>
    %37 = vector.broadcast %36 : vector<1x128xf32> to vector<8x128xf32>
    %38 = arith.subf %30, %37 : vector<8x128xf32>
    %39 = math.exp %38 : vector<8x128xf32>
    %cst_15 = arith.constant dense<0.000000e+00> : vector<128xf32>
    %40 = vector.multi_reduction <add>, %39, %cst_15 [0] : vector<8x128xf32> to vector<128xf32>
    %41 = vector.shape_cast %40 : vector<128xf32> to vector<1x128xf32>
    %42 = math.log %41 : vector<1x128xf32>
    %43 = arith.addf %42, %36 : vector<1x128xf32>
    %44 = arith.extui %28 : vector<8x128xi1> to vector<8x128xi32>
    %45 = arith.sitofp %44 : vector<8x128xi32> to vector<8x128xf32>
    %cst_16 = arith.constant dense<0.000000e+00> : vector<128xf32>
    %46 = vector.multi_reduction <add>, %45, %cst_16 [0] : vector<8x128xf32> to vector<128xf32>
    %47 = vector.shape_cast %46 : vector<128xf32> to vector<1x128xf32>
    %cst_17 = arith.constant 1.250000e-01 : f32
    %48 = vector.broadcast %cst_17 : f32 to vector<1x128xf32>
    %49 = arith.mulf %47, %48 : vector<1x128xf32>
    %cst_18 = arith.constant 0xFF800000 : f32
    %50 = vector.broadcast %cst_18 : f32 to vector<8x128xf32>
    %51 = arith.select %28, %50, %17 : vector<8x128xi1>, vector<8x128xf32>
    %cst_19 = arith.constant dense<0xFF800000> : vector<128xf32>
    %52 = vector.multi_reduction <maximumf>, %51, %cst_19 [0] : vector<8x128xf32> to vector<128xf32>
    %53 = vector.shape_cast %52 : vector<128xf32> to vector<1x128xf32>
    %cst_20 = arith.constant 0xFF800000 : f32
    %54 = vector.broadcast %cst_20 : f32 to vector<1x128xf32>
    %55 = arith.cmpf ogt, %53, %54 : vector<1x128xf32>
    %cst_21 = arith.constant 0.000000e+00 : f32
    %56 = vector.broadcast %cst_21 : f32 to vector<1x128xf32>
    %57 = arith.select %55, %53, %56 : vector<1x128xi1>, vector<1x128xf32>
    %58 = vector.broadcast %57 : vector<1x128xf32> to vector<8x128xf32>
    %59 = arith.subf %51, %58 : vector<8x128xf32>
    %60 = math.exp %59 : vector<8x128xf32>
    %cst_22 = arith.constant dense<0.000000e+00> : vector<128xf32>
    %61 = vector.multi_reduction <add>, %60, %cst_22 [0] : vector<8x128xf32> to vector<128xf32>
    %62 = vector.shape_cast %61 : vector<128xf32> to vector<1x128xf32>
    %63 = math.log %62 : vector<1x128xf32>
    %64 = arith.addf %63, %57 : vector<1x128xf32>
    %65 = tpu.iota {dimensions = array<i32: 1>} : vector<1x128xi32>
    %66 = vector.broadcast %23 : i32 to vector<1x128xi32>
    %67 = arith.addi %66, %65 : vector<1x128xi32>
    %c4_i32 = arith.constant 4 : i32
    %68 = vector.broadcast %c4_i32 : i32 to vector<1x128xi32>
    %69 = arith.cmpi slt, %67, %68 : vector<1x128xi32>
    %70 = arith.extui %69 : vector<1x128xi1> to vector<1x128xi32>
    %71 = arith.sitofp %70 : vector<1x128xi32> to vector<1x128xf32>
    %cst_23 = arith.constant 2.500000e-01 : f32
    %72 = vector.broadcast %cst_23 : f32 to vector<1x128xf32>
    %73 = arith.mulf %71, %72 : vector<1x128xf32>
    %cst_24 = arith.constant 0.000000e+00 : f32
    %74 = vector.broadcast %cst_24 : f32 to vector<1x128xf32>
    %75 = arith.maximumf %43, %74 : vector<1x128xf32>
    %76 = vector.broadcast %cst_24 : f32 to vector<1x128xf32>
    %77 = arith.subf %43, %76 : vector<1x128xf32>
    %78 = arith.cmpf one, %77, %77 : vector<1x128xf32>
    %79 = vector.broadcast %cst_24 : f32 to vector<1x128xf32>
    %80 = arith.addf %43, %79 : vector<1x128xf32>
    %81 = math.absf %77 : vector<1x128xf32>
    %cst_25 = arith.constant 0.000000e+00 : f32
    %82 = vector.broadcast %cst_25 : f32 to vector<1x128xf32>
    %83 = arith.subf %82, %81 : vector<1x128xf32>
    %84 = math.exp %83 : vector<1x128xf32>
    %85 = math.log1p %84 : vector<1x128xf32>
    %86 = arith.addf %75, %85 : vector<1x128xf32>
    %87 = arith.select %78, %80, %86 : vector<1x128xi1>, vector<1x128xf32>
    %88 = arith.mulf %49, %87 : vector<1x128xf32>
    %cst_26 = arith.constant 0.000000e+00 : f32
    %89 = vector.broadcast %cst_26 : f32 to vector<1x128xf32>
    %90 = arith.maximumf %64, %89 : vector<1x128xf32>
    %91 = vector.broadcast %cst_26 : f32 to vector<1x128xf32>
    %92 = arith.subf %64, %91 : vector<1x128xf32>
    %93 = arith.cmpf one, %92, %92 : vector<1x128xf32>
    %94 = vector.broadcast %cst_26 : f32 to vector<1x128xf32>
    %95 = arith.addf %64, %94 : vector<1x128xf32>
    %96 = math.absf %92 : vector<1x128xf32>
    %cst_27 = arith.constant 0.000000e+00 : f32
    %97 = vector.broadcast %cst_27 : f32 to vector<1x128xf32>
    %98 = arith.subf %97, %96 : vector<1x128xf32>
    %99 = math.exp %98 : vector<1x128xf32>
    %100 = math.log1p %99 : vector<1x128xf32>
    %101 = arith.addf %90, %100 : vector<1x128xf32>
    %102 = arith.select %93, %95, %101 : vector<1x128xi1>, vector<1x128xf32>
    %103 = arith.mulf %73, %102 : vector<1x128xf32>
    %104 = arith.addf %88, %103 : vector<1x128xf32>
    %c0_28 = arith.constant 0 : index
    %c0_29 = arith.constant 0 : index
    %c0_30 = arith.constant 0 : index
    %105 = vector.load %arg5[%c0_28, %c0_29, %c0_30] : memref<1x1x128xf32, #tpu.memory_space<vmem>>, vector<1x1x128xf32>
    %106 = vector.shape_cast %104 : vector<1x128xf32> to vector<1x1x128xf32>
    %107 = arith.addf %105, %106 : vector<1x1x128xf32>
    %c0_31 = arith.constant 0 : index
    %c0_32 = arith.constant 0 : index
    %c0_33 = arith.constant 0 : index
    %108 = vector.load %arg5[%c0_31, %c0_32, %c0_33] : memref<1x1x128xf32, #tpu.memory_space<vmem>>, vector<1x1x128xf32>
    tpu.vector_store %arg5[%c0_31, %c0_32, %c0_33], %107 {strides = array<i32>} : memref<1x1x128xf32, #tpu.memory_space<vmem>>, vector<1x1x128xf32>,
    return
  }
  func.func @transform_0(%arg0: i32, %arg1: i32) -> (i32, i32) {
    %c0_i32 = arith.constant 0 : i32
    %c0_i32_0 = arith.constant 0 : i32
    %c0_i32_1 = arith.constant 0 : i32
    return %c0_i32, %c0_i32_0 : i32, i32
  }
  func.func @transform_1(%arg0: i32, %arg1: i32) -> (i32, i32) {
    %c0_i32 = arith.constant 0 : i32
    %c0_i32_0 = arith.constant 0 : i32
    %c0_i32_1 = arith.constant 0 : i32
    return %c0_i32, %c0_i32_0 : i32, i32
  }
  func.func @transform_2(%arg0: i32, %arg1: i32) -> (i32, i32) {
    %c1_i32 = arith.constant 1 : i32
    %0 = arith.muli %arg0, %c1_i32 : i32
    %1 = arith.addi %0, %arg1 : i32
    %c0_i32 = arith.constant 0 : i32
    %c0_i32_0 = arith.constant 0 : i32
    return %c0_i32, %1 : i32, i32
  }
  func.func @transform_3(%arg0: i32, %arg1: i32) -> (i32, i32, i32) {
    %c0_i32 = arith.constant 0 : i32
    %c0_i32_0 = arith.constant 0 : i32
    %c0_i32_1 = arith.constant 0 : i32
    return %arg0, %c0_i32, %c0_i32_0 : i32, i32, i32
  }
}

</mosaic_0001>

<bundles_post_ra>
// kernel: tpu_custom_call.1
= control target key start
LH: loop header
LB: loop body
LE: loop exit
PB: predicated region body
PF: predicated region fallthrough
CT: control target
= control target key end

     0   :  { %8 = vsyncpa [#allocation3], 0  ;;  %s434_s0 = inlined_call_operand.vmem [shape: s32[8,1], index: 0, kind: input, shape index: {}]   ;;  %s435_s1 = inlined_call_operand.vmem [shape: f32[8,32], index: 1, kind: input, shape index: {}]   ;;  %s436_s2 = inlined_call_operand.hbm [shape: f32[32,128], index: 2, kind: input, shape index: {}]   ;;  %s437_s3 = inlined_call_operand.hbm [shape: f32[1,1,128], index: 3, kind: output, shape index: {}]  }
   0x1   :  { %9 = vsyncpa [#allocation4], 0  ;;  %s362_s12 = smov [#allocation2]   ;;  %s314_s16 = scalar_lea.hbm %s436_s2, 512 }
   0x2   :  { %s22_s13 = sshll.u32 %s362_s12, 4  ;;  %p315_p0 = scmp.ne.s32.totalorder %s436_s2, %s314_s16  ;;  %s23_s13 = int_to_ptr.vmem [resolvable:$true] %s22_s13 }
   0x3   :  { %p318_p1 = scmp.lt.u32.totalorder %s314_s16, %s436_s2 }
   0x5   :  { %p320_p2 = pnand %p318_p1, %p315_p0 }
   0x7   :  { %323 = shalt.err (!%p320_p2)
}
   0x8   :  { %s324_s21 = scalar_lea.vmem %s23_s13, 512  ;;  %p329_p4 = scmp.lt.s32.totalorder %s23_s13, %s23_s13 }
   0x9   :  { %p325_p3 = scmp.ne.s32.totalorder %s23_s13, %s324_s21  ;;  %p330_p5 = scmp.lt.s32.totalorder %s324_s21, %s324_s21 }
   0xb   :  { %p331_p6 = por %p330_p5, %p329_p4 }
   0xd   :  { %p332_p7 = pnand %p331_p6, %p325_p3 }
   0xf   :  { %335 = shalt.err (!%p332_p7)
}
  0x10   :  { %s363_s22 = smov 128   ;;  %s364_s23 = smov 8  }
  0x11   :  { %28 = dma.hbm_to_vmem [thread:$0]  %s436_s2, 512, %s23_s13, [#allocation3], %s363_s22, %s363_s22, %s364_s23  }
  0x12   :  { %358 = dma.done.wait [#allocation3], 512  }
  0x13   :  { %359 = vsyncadd [#allocation3], 4294966784  ;;  %v365_v0 = vmov 0.0|0.0   ;;  %vm366_vm0 = vmmov 0   ;;  %v367_v1 = vmov 0.0   ;;  %v368_v2 = vmov 0  }
  0x14   :  { %281 = vmatprep.subr.bf16.mxu0 %v365_v0  ;;  %278 = vmatprep.mubr.msk.f32.mxu0 %vm366_vm0, %v367_v1  ;;  %37 = vst [vmem:[#allocation5] sm:$0x1] %v367_v1  ;;  %v38_v3 = vld [vmem:[#allocation2] sm:$0xff]  ;;  %v39_v4 = vld [vmem:[#allocation2 + $0x8] sm:$0xff]  ;;  %v40_v5 = vld [vmem:[#allocation2 + $0x10] sm:$0xff]  ;;  %vm62_vm1 = vcmask 261120   ;;  %v142_v30 = vlaneseq }
  0x15   :  { %295 = vset.pattern.permute.xlu0 %v368_v2  ;;  %v41_v6 = vld [vmem:[#allocation2 + $0x18] sm:$0xff]  ;;  %v42_v7 = vmul.f32 %v38_v3, %v38_v3  ;;  %v43_v8 = vmul.f32 %v39_v4, %v39_v4  ;;  %v44_v9 = vmul.f32 %v40_v5, %v40_v5  ;;  %v139_v10 = vld [vmem:[%s434_s0] sm:$0xff] }
  0x16   :  { %147 = vperm.xlu0 %295, %v139_v10   ;;  %v45_v11 = vmul.f32 %v41_v6, %v41_v6  ;;  %v61_v29 = vld [vmem:[%s435_s1] sm:$0xff]  ;;  %v410_v31 = vand.u32 127, %v142_v30  ;;  %s369_s1 = smov [#allocation5]  }
  0x17   :  { %v46_v12 = vadd.f32 %v43_v8, %v42_v7  ;;  %s253_s28 = sshll.u32 %s369_s1, 4  ;;  %s254_s28 = int_to_ptr.vmem [resolvable:$true] %s253_s28 }
  0x18   :  { %vm201_vm5 = vcmp.lt.s32.totalorder %v410_v31, 4  ;;  %s336_s29 = scalar_lea.vmem %s254_s28, 16  ;;  %s340_s30 = scalar_lea.vmem %s254_s28, 32 }
  0x19   :  { %v47_v13 = vadd.f32 %v46_v12, %v44_v9  ;;  %p337_p8 = scmp.ne.s32.totalorder %s254_s28, %s336_s29  ;;  %p341_p9 = scmp.lt.s32.totalorder %s254_s28, %s254_s28 }
  0x1a   :  { %p342_p10 = scmp.lt.s32.totalorder %s340_s30, %s336_s29 }
  0x1b   :  { %v48_v14 = vadd.f32 %v47_v13, %v45_v11 }
  0x1c   :  { %p343_p11 = por %p342_p10, %p341_p9 }
  0x1d   :  { %v49_v15 = vrot.slane %v48_v14, 4 }
  0x1e   :  { %p344_p12 = pnand %p343_p11, %p337_p8 }
  0x1f   :  { %v50_v16 = vadd.f32 %v49_v15, %v48_v14 }
  0x21   :  { %v51_v17 = vrot.slane %v50_v16, 2 }
  0x23   :  { %v52_v18 = vadd.f32 %v51_v17, %v50_v16 }
  0x25   :  { %v53_v19 = vrot.slane %v52_v18, 1 }
  0x27   :  { %v54_v20 = vadd.f32 %v53_v19, %v52_v18 }
  0x29   :  { %v55_v21 = vmax.f32 %v54_v20, 1e-24 }
  0x2b   :  { %296 = vrsqrt.f32 %v55_v21 }
  0x35   :  { %v297_v22 = vpop.eup %296 }
  0x36   :  { %v57_v23 = vmul.f32 %v297_v22, %v38_v3  ;;  %v58_v24 = vmul.f32 %v297_v22, %v39_v4  ;;  %v59_v25 = vmul.f32 %v297_v22, %v40_v5  ;;  %v60_v26 = vmul.f32 %v297_v22, %v41_v6 }
  0x38   :  { %v282_v27 = vpack.c.bf16 %v58_v24, %v57_v23  ;;  %v285_v28 = vpack.c.bf16 %v60_v26, %v59_v25 }
  0x3a   :  { %283 = vmatpush3.bf16.msra.mxu0 %v282_v27 }
  0x3b   :  { %284 = vmatprep.subr.bf16.mxu0 %v365_v0 }
  0x3e   :  { %286 = vmatpush3.bf16.msra.mxu0 %v285_v28 }
  0x41   :  { %279 = vmatmul.mubr.msk.f32.vlgmr.msra.gmra.mrb[0].mxu0 %vm62_vm1, %v61_v29 }
  0x95   :  { %v148_v33 = vpop.permute.xlu0 %147 }
  0x96   :  { %vm149_vm2 = vcmp.eq.s32.totalorder %v148_v33, %v410_v31 }
  0x97   :  { %v263_v21 = vsel %vm149_vm2, 1.0, %v367_v1 }
  0x98   :  { %v173_v22 = vrot.slane %v263_v21, 4 }
  0x9a   :  { %v174_v24 = vadd.f32 %v263_v21, %v173_v22 }
  0x9c   :  { %v175_v28 = vrot.slane %v174_v24, 2 }
  0x9e   :  { %v176_v30 = vadd.f32 %v175_v28, %v174_v24 }
 0x114   :  { %v132_v32 = vpop.f32.mrb[0].mxu0 }
 0x115   :  { %v136_v34 = vmul.f32 32.0, %v132_v32  ;;  %v280_v35 = vpop.f32.mrb[1].mxu0 }
 0x117   :  { %v137_v36 = vadd.f32 3.2, %v136_v34 }
 0x119   :  { %v138_v37 = vsub.f32 6.4, %v137_v36  ;;  %v180_v38 = vsel %vm149_vm2, -inf, %v137_v36  ;;  %v177_v36 = vrot.slane %v176_v30, 1 }
 0x11a   :  { %v181_v39 = vrot.slane %v180_v38, 4 }
 0x11b   :  { %v150_v40 = vsel %vm149_vm2, %v138_v37, -inf }
 0x11c   :  { %v151_v41 = vrot.slane %v150_v40, 4  ;;  %v182_v42 = vmax.f32 %v180_v38, %v181_v39 }
 0x11e   :  { %v152_v43 = vmax.f32 %v150_v40, %v151_v41  ;;  %v183_v44 = vrot.slane %v182_v42, 2 }
 0x120   :  { %v153_v45 = vrot.slane %v152_v43, 2  ;;  %v184_v46 = vmax.f32 %v182_v42, %v183_v44  ;;  %v264_v42 = vsel %vm201_vm5, 1.0, %v367_v1  ;;  %v178_v44 = vadd.f32 %v177_v36, %v176_v30  ;;  %v244_v1 = vld [vmem:[#allocation5] sm:$0x1] }
 0x122   :  { %v154_v47 = vmax.f32 %v152_v43, %v153_v45  ;;  %v185_v48 = vrot.slane %v184_v46, 1 }
 0x124   :  { %v155_v49 = vrot.slane %v154_v47, 1  ;;  %v186_v50 = vmax.f32 %v184_v46, %v185_v48 }
 0x126   :  { %v156_v51 = vmax.f32 %v154_v47, %v155_v49  ;;  %vm187_vm3 = vcmp.gt.f32.partialorder %v186_v50, -inf }
 0x127   :  { %v188_v52 = vsel %vm187_vm3, %v186_v50, 0.0  ;;  %v204_v50 = vmul.f32 0.25, %v264_v42 }
 0x128   :  { %vm157_vm4 = vcmp.gt.f32.partialorder %v156_v51, -inf  ;;  %v189_v53 = vsub.f32 %v180_v38, %v188_v52 }
 0x129   :  { %v158_v54 = vsel %vm157_vm4, %v156_v51, 0.0 }
 0x12a   :  { %v159_v55 = vsub.f32 %v150_v40, %v158_v54  ;;  %v190_v56 = vmul.f32 1.442695, %v189_v53  ;;  %v179_v53 = vmul.f32 0.125, %v178_v44 }
 0x12c   :  { %v160_v57 = vmul.f32 1.442695, %v159_v55  ;;  %298 = vpow2.f32 %v190_v56 }
 0x12e   :  { %300 = vpow2.f32 %v160_v57 }
 0x136   :  { %v299_v58 = vpop.eup %298 }
 0x137   :  { %v192_v59 = vrot.slane %v299_v58, 4 }
 0x138   :  { %v301_v60 = vpop.eup %300 }
 0x139   :  { %v162_v61 = vrot.slane %v301_v60, 4  ;;  %v193_v62 = vadd.f32 %v299_v58, %v192_v59 }
 0x13b   :  { %v163_v63 = vadd.f32 %v301_v60, %v162_v61  ;;  %v194_v0 = vrot.slane %v193_v62, 2 }
 0x13d   :  { %v164_v2 = vrot.slane %v163_v63, 2  ;;  %v195_v3 = vadd.f32 %v194_v0, %v193_v62 }
 0x13f   :  { %v165_v4 = vadd.f32 %v164_v2, %v163_v63  ;;  %v196_v5 = vrot.slane %v195_v3, 1 }
 0x141   :  { %v166_v6 = vrot.slane %v165_v4, 1  ;;  %v197_v7 = vadd.f32 %v196_v5, %v195_v3 }
 0x143   :  { %v167_v8 = vadd.f32 %v166_v6, %v165_v4  ;;  %302 = vlog2.f32 %v197_v7 }
 0x145   :  { %304 = vlog2.f32 %v167_v8 }
 0x14d   :  { %v303_v9 = vpop.eup %302 }
 0x14e   :  { %v199_v10 = vmul.f32 0.6931472, %v303_v9 }
 0x14f   :  { %v305_v11 = vpop.eup %304 }
 0x150   :  { %v169_v12 = vmul.f32 0.6931472, %v305_v11  ;;  %v200_v13 = vadd.f32 %v199_v10, %v188_v52 }
 0x152   :  { %v170_v14 = vadd.f32 %v169_v12, %v158_v54  ;;  %v227_v15 = vand.u32 2147483647, %v200_v13  ;;  %v224_v43 = vmax.f32 %v200_v13, 0.0  ;;  %vm225_vm8 = vcmp.ne.f32.partialorder %v200_v13, %v200_v13 }
 0x154   :  { %v208_v16 = vand.u32 2147483647, %v170_v14  ;;  %v228_v17 = vsub.f32 0.0, %v227_v15  ;;  %v205_v48 = vmax.f32 %v170_v14, 0.0  ;;  %vm206_vm9 = vcmp.ne.f32.partialorder %v170_v14, %v170_v14 }
 0x156   :  { %v209_v18 = vsub.f32 0.0, %v208_v16  ;;  %v229_v19 = vmul.f32 1.442695, %v228_v17 }
 0x158   :  { %v210_v20 = vmul.f32 1.442695, %v209_v18  ;;  %306 = vpow2.f32 %v229_v19 }
 0x15a   :  { %308 = vpow2.f32 %v210_v20 }
 0x162   :  { %v307_v23 = vpop.eup %306 }
 0x163   :  { %v231_v25 = vadd.f32 1.0, %v307_v23  ;;  %v234_v29 = vmul.f32 -0.5, %v307_v23  ;;  %v237_v35 = vand.u32 2147483647, %v307_v23 }
 0x164   :  { %v309_v26 = vpop.eup %308 }
 0x165   :  { %v212_v27 = vadd.f32 1.0, %v309_v26  ;;  %310 = vlog2.f32 %v231_v25  ;;  %v215_v32 = vmul.f32 -0.5, %v309_v26  ;;  %v235_v34 = vadd.f32 1.0, %v234_v29 }
 0x166   :  { %v218_v38 = vand.u32 2147483647, %v309_v26  ;;  %vm238_vm6 = vcmp.lt.f32.partialorder %v237_v35, 0.0004427343 }
 0x167   :  { %312 = vlog2.f32 %v212_v27  ;;  %v216_v37 = vadd.f32 1.0, %v215_v32  ;;  %v236_v40 = vmul.f32 %v307_v23, %v235_v34 }
 0x168   :  { %vm219_vm7 = vcmp.lt.f32.partialorder %v218_v38, 0.0004427343 }
 0x169   :  { %v217_v46 = vmul.f32 %v309_v26, %v216_v37 }
 0x16f   :  { %v311_v33 = vpop.eup %310 }
 0x170   :  { %v233_v39 = vmul.f32 0.6931472, %v311_v33 }
 0x171   :  { %v313_v41 = vpop.eup %312 }
 0x172   :  { %v214_v45 = vmul.f32 0.6931472, %v313_v41  ;;  %v239_v47 = vsel %vm238_vm6, %v236_v40, %v233_v39 }
 0x173   :  { %v240_v49 = vadd.f32 %v239_v47, %v224_v43 }
 0x174   :  { %v220_v31 = vsel %vm219_vm7, %v217_v46, %v214_v45 }
 0x175   :  { %v221_v51 = vadd.f32 %v220_v31, %v205_v48  ;;  %v241_v52 = vsel %vm225_vm8, %v200_v13, %v240_v49 }
 0x176   :  { %v242_v56 = vmul.f32 %v241_v52, %v204_v50 }
 0x177   :  { %v222_v54 = vsel %vm206_vm9, %v170_v14, %v221_v51 }
 0x178   :  { %v223_v55 = vmul.f32 %v222_v54, %v179_v53 }
 0x17a   :  { %v243_v57 = vadd.f32 %v242_v56, %v223_v55 }
 0x17c   :  { %v245_v58 = vadd.f32 %v244_v1, %v243_v57 }
 0x17e   :  { %246 = vst [vmem:[#allocation5] sm:$0x1] %v245_v58 }
 0x17f   :  { %347 = shalt.err (!%p344_p12)
}
 0x180   :  { %s348_s6 = scalar_lea.hbm %s437_s3, 16 }
 0x181   :  { %p349_p13 = scmp.ne.s32.totalorder %s437_s3, %s348_s6  ;;  %p352_p0 = scmp.lt.u32.totalorder %s348_s6, %s437_s3 }
 0x183   :  { %p354_p1 = pnand %p352_p0, %p349_p13 }
 0x185   :  { %357 = shalt.err (!%p354_p1)
}
 0x186   :  { %256 = dma.vmem_to_hbm [thread:$0]  %s254_s28, 16, %s437_s3, [#allocation4]  }
 0x187   :  { %360 = dma.done.wait [#allocation4], 16  }
 0x188   :  { %361 = vsyncadd [#allocation4], 4294967280 }
 0x189   :  { %260 = vsyncpa [#allocation3], 1 }
 0x18a   :  { %261 = vsyncpa [#allocation4], 1 }

</bundles_post_ra>
